<compile_context>
chip_gen: v7x
topology: tpu7x:2x2x1
jax: 0.10.0
libtpu: 0.0.40
codegen_flags: <defaults>
</compile_context>

<pallas_src>
import functools

import jax
import jax.numpy as jnp
from jax import lax
from jax.experimental import pallas as pl
from jax.experimental.pallas import tpu as pltpu


_NUM_CORE_SPLITS = 2  # leading "parallel" grid axis; ~2x on v7x, harmless on 1-TC chips


def _round_up(x, m):
    return (x + m - 1) // m * m


def _int_pow(v, gamma):
    """v ** gamma as plain VPU multiplies when gamma is a small integer."""
    g = float(gamma)
    if g == int(g) and 0 <= int(g) <= 8:
        n = int(g)
        if n == 0:
            return jnp.ones_like(v)
        r = v
        for _ in range(n - 1):
            r = r * v
        return r
    return v ** g  # non-integer gamma: falls back to exp/log on the EUP


def _focal_loss_kernel(x_ref, t_ref, acc_ref, *, gamma, alpha, n_class):
    i = pl.program_id(1)

    @pl.when(i == 0)
    def _():
        acc_ref[...] = jnp.zeros_like(acc_ref)

    x = x_ref[...].astype(jnp.float32)        # (tr, W) logits
    t = t_ref[...]                            # (tr, W) int32 per-element target

    # Class id for each lane: repeating 1..C pattern along the lane axis.
    ids = lax.broadcasted_iota(jnp.int32, x.shape, 1) % n_class + 1

    # Shared transcendentals: one exp + one log1p give both log-sigmoids,
    # one divide gives both p and 1-p (stable for saturated logits).
    e = jnp.exp(-jnp.abs(x))                  # exp(-|x|) in (0, 1]
    log1pe = jnp.log1p(e)
    log_p = jnp.minimum(x, 0.0) - log1pe      # log(sigmoid(x))
    log_q = jnp.minimum(-x, 0.0) - log1pe     # log(1 - sigmoid(x))
    inv = 1.0 / (1.0 + e)
    p = jnp.where(x >= 0, 1.0, e) * inv       # sigmoid(x)
    q = jnp.where(x >= 0, e, 1.0) * inv       # 1 - sigmoid(x)

    term1 = _int_pow(q, gamma) * log_p        # (1-p)^g * log(p)
    term2 = _int_pow(p, gamma) * log_q        # p^g * log(1-p)

    pos = t == ids
    neg = jnp.logical_and(t != ids, t >= 0)
    loss = (jnp.where(pos, (-alpha) * term1, 0.0)
            + jnp.where(neg, (alpha - 1.0) * term2, 0.0))

    # vreg-shaped partial sums: reduce sublane-blocks with cheap VPU adds into
    # the resident (8, W) output block; no per-step cross-lane XLU reduce.
    tr, w = loss.shape
    acc_ref[...] += loss.reshape(tr // 8, 8, w).sum(axis=0)


def sigmoid_focal_loss(out, target, *, gamma, alpha, tile_rows=1024):
    """Pallas TPU implementation of SigmoidFocalLoss.forward.

    out:    (N, C) float logits (float32 or bfloat16; upcast in-kernel)
    target: (N,)   int class ids (1..C positive, 0 background, <0 ignored)
    returns scalar float32 loss (sum over all elements).
    """
    N, C = out.shape

    # Lane-dense packing: fold several samples into one 128-lane row.
    if 0 < C <= 128 and 128 % C == 0:
        fold = 128 // C
    else:
        fold = 1  # fallback: one sample per row (lanes partially padded)
    W = fold * C

    # Row tiling of the packed layout; cap so double-buffered inputs stay small.
    R = pl.cdiv(N, fold)
    max_rows = max(8, ((2 * 1024 * 1024) // (W * 4)) // 8 * 8)
    tr = min(_round_up(tile_rows, 8), max_rows, _round_up(R, 8))
    R_pad = _round_up(R, tr * _NUM_CORE_SPLITS)
    tiles_per_core = R_pad // (tr * _NUM_CORE_SPLITS)
    N_pad = R_pad * fold

    tgt = target.astype(jnp.int32)
    x = out
    if N_pad != N:
        x = jnp.pad(x, ((0, N_pad - N), (0, 0)))
        tgt = jnp.pad(tgt, (0, N_pad - N), constant_values=-1)  # -1 -> ignored

    # Pack logits lane-dense; expand target along classes so each lane carries
    # its own (sample, class) pair (no in-kernel cross-lane broadcast).
    x_packed = x.reshape(R_pad, W)
    t_packed = jnp.broadcast_to(tgt[:, None], (N_pad, C)).reshape(R_pad, W)

    kernel = functools.partial(_focal_loss_kernel,
                               gamma=float(gamma), alpha=float(alpha),
                               n_class=int(C))

    partials = pl.pallas_call(
        kernel,
        out_shape=jax.ShapeDtypeStruct((_NUM_CORE_SPLITS * 8, W), jnp.float32),
        grid_spec=pltpu.PrefetchScalarGridSpec(
            num_scalar_prefetch=0,
            grid=(_NUM_CORE_SPLITS, tiles_per_core),
            in_specs=[
                pl.BlockSpec((tr, W), lambda c, i: (c * tiles_per_core + i, 0)),
                pl.BlockSpec((tr, W), lambda c, i: (c * tiles_per_core + i, 0)),
            ],
            out_specs=pl.BlockSpec((8, W), lambda c, i: (c, 0)),
        ),
        compiler_params=pltpu.CompilerParams(
            dimension_semantics=("parallel", "arbitrary")),
    )(x_packed, t_packed)

    # Tiny final reduce (2*8*W elements) done by XLA outside the kernel.
    return jnp.sum(partials)


def _reference(out, target, gamma, alpha):
    """Pure-JAX reference mirroring the PyTorch module exactly."""
    n_class = out.shape[1]
    class_ids = jnp.arange(1, n_class + 1, dtype=target.dtype)[None, :]
    t = target[:, None]
    p = jax.nn.sigmoid(out)
    term1 = (1.0 - p) ** gamma * jnp.log(p)
    term2 = p ** gamma * jnp.log(1.0 - p)
    loss = (-(t == class_ids).astype(jnp.float32) * alpha * term1
            - ((t != class_ids) & (t >= 0)).astype(jnp.float32)
            * (1.0 - alpha) * term2)
    return loss.sum()


if __name__ == "__main__":
    gamma = 2.0
    alpha = 0.25

    N, C = 64, 8
    key = jax.random.PRNGKey(0)
    k_out, k_tgt = jax.random.split(key)

    out = jax.random.normal(k_out, (N, C), dtype=jnp.float32)
    # targets in {0, 1, ..., C}: 0 = background, 1..C = positive class ids
    target = jax.random.randint(k_tgt, (N,), 0, C + 1, dtype=jnp.int32)

    loss = sigmoid_focal_loss(out, target, gamma=gamma, alpha=alpha)
    jax.block_until_ready(loss)

    ref = _reference(out, target, gamma, alpha)
    assert jnp.allclose(loss, ref, rtol=1e-5, atol=1e-4), (loss, ref)

    print("KERNEL_OK")
</pallas_src>

<mosaic_0001>
module attributes {stable_mosaic.version = 11 : i64} {
  func.func @_focal_loss_kernel(%arg0: i32, %arg1: i32, %arg2: memref<8x128xf32, #tpu.memory_space<vmem>>, %arg3: memref<8x128xi32, #tpu.memory_space<vmem>>, %arg4: memref<8x128xf32, #tpu.memory_space<vmem>>) attributes {dimension_semantics = [#tpu.dimension_semantics<parallel>, #tpu.dimension_semantics<arbitrary>], iteration_bounds = array<i64: 2, 1>, scalar_prefetch = 0 : i64, scratch_operands = 0 : i64, tpu.core_type = #tpu.core_type<tc>, window_params = [{transform_indices = @transform_0, window_bounds = array<i64: 8, 128>}, {transform_indices = @transform_1, window_bounds = array<i64: 8, 128>}, {transform_indices = @transform_2, window_bounds = array<i64: 8, 128>}]} {
    %c0_i32 = arith.constant 0 : i32
    %0 = arith.cmpi eq, %arg1, %c0_i32 : i32
    %1 = arith.extui %0 : i1 to i32
    %c0_i32_0 = arith.constant 0 : i32
    %2 = arith.cmpi ne, %1, %c0_i32_0 : i32
    scf.if %2 {
      %cst_28 = arith.constant 0.000000e+00 : f32
      %74 = vector.broadcast %cst_28 : f32 to vector<8x128xf32>
      %c0_29 = arith.constant 0 : index
      %c0_30 = arith.constant 0 : index
      %75 = vector.load %arg4[%c0_29, %c0_30] : memref<8x128xf32, #tpu.memory_space<vmem>>, vector<8x128xf32>
      tpu.vector_store %arg4[%c0_29, %c0_30], %74 {strides = array<i32>} : memref<8x128xf32, #tpu.memory_space<vmem>>, vector<8x128xf32>,
    } else {
    }
    %c0 = arith.constant 0 : index
    %c0_1 = arith.constant 0 : index
    %3 = vector.load %arg2[%c0, %c0_1] : memref<8x128xf32, #tpu.memory_space<vmem>>, vector<8x128xf32>
    %c0_2 = arith.constant 0 : index
    %c0_3 = arith.constant 0 : index
    %4 = vector.load %arg3[%c0_2, %c0_3] : memref<8x128xi32, #tpu.memory_space<vmem>>, vector<8x128xi32>
    %5 = tpu.iota {dimensions = array<i32: 1>} : vector<8x128xi32>
    %c8_i32 = arith.constant 8 : i32
    %c0_i32_4 = arith.constant 0 : i32
    %6 = arith.cmpi eq, %c8_i32, %c0_i32_4 : i32
    %c1_i32 = arith.constant 1 : i32
    %7 = arith.select %6, %c1_i32, %c8_i32 : i32
    %8 = vector.broadcast %7 : i32 to vector<8x128xi32>
    %9 = arith.remsi %5, %8 : vector<8x128xi32>
    %c0_i32_5 = arith.constant 0 : i32
    %10 = vector.broadcast %c0_i32_5 : i32 to vector<8x128xi32>
    %11 = arith.cmpi ne, %9, %10 : vector<8x128xi32>
    %c0_i32_6 = arith.constant 0 : i32
    %12 = vector.broadcast %c0_i32_6 : i32 to vector<8x128xi32>
    %13 = arith.cmpi slt, %9, %12 : vector<8x128xi32>
    %c0_i32_7 = arith.constant 0 : i32
    %14 = arith.cmpi slt, %7, %c0_i32_7 : i32
    %15 = vector.broadcast %14 : i1 to vector<8x128xi1>
    %16 = vector.broadcast %15 : vector<8x128xi1> to vector<8x128xi1>
    %17 = arith.xori %13, %16 : vector<8x128xi1>
    %18 = arith.andi %17, %11 : vector<8x128xi1>
    %19 = vector.broadcast %7 : i32 to vector<8x128xi32>
    %20 = arith.addi %9, %19 : vector<8x128xi32>
    %21 = arith.select %18, %20, %9 : vector<8x128xi1>, vector<8x128xi32>
    %c1_i32_8 = arith.constant 1 : i32
    %22 = vector.broadcast %c1_i32_8 : i32 to vector<8x128xi32>
    %23 = arith.addi %21, %22 : vector<8x128xi32>
    %24 = math.absf %3 : vector<8x128xf32>
    %cst = arith.constant 0.000000e+00 : f32
    %25 = vector.broadcast %cst : f32 to vector<8x128xf32>
    %26 = arith.subf %25, %24 : vector<8x128xf32>
    %27 = math.exp %26 : vector<8x128xf32>
    %28 = math.log1p %27 : vector<8x128xf32>
    %cst_9 = arith.constant 0.000000e+00 : f32
    %29 = vector.broadcast %cst_9 : f32 to vector<8x128xf32>
    %30 = arith.minimumf %3, %29 : vector<8x128xf32>
    %31 = arith.subf %30, %28 : vector<8x128xf32>
    %cst_10 = arith.constant 0.000000e+00 : f32
    %32 = vector.broadcast %cst_10 : f32 to vector<8x128xf32>
    %33 = arith.subf %32, %3 : vector<8x128xf32>
    %cst_11 = arith.constant 0.000000e+00 : f32
    %34 = vector.broadcast %cst_11 : f32 to vector<8x128xf32>
    %35 = arith.minimumf %33, %34 : vector<8x128xf32>
    %36 = arith.subf %35, %28 : vector<8x128xf32>
    %cst_12 = arith.constant 1.000000e+00 : f32
    %37 = vector.broadcast %cst_12 : f32 to vector<8x128xf32>
    %38 = arith.addf %37, %27 : vector<8x128xf32>
    %cst_13 = arith.constant 1.000000e+00 : f32
    %39 = vector.broadcast %cst_13 : f32 to vector<8x128xf32>
    %40 = arith.divf %39, %38 : vector<8x128xf32>
    %cst_14 = arith.constant 0.000000e+00 : f32
    %41 = vector.broadcast %cst_14 : f32 to vector<8x128xf32>
    %42 = arith.cmpf oge, %3, %41 : vector<8x128xf32>
    %cst_15 = arith.constant 1.000000e+00 : f32
    %43 = vector.broadcast %cst_15 : f32 to vector<8x128xf32>
    %44 = arith.select %42, %43, %27 : vector<8x128xi1>, vector<8x128xf32>
    %45 = arith.mulf %44, %40 : vector<8x128xf32>
    %cst_16 = arith.constant 0.000000e+00 : f32
    %46 = vector.broadcast %cst_16 : f32 to vector<8x128xf32>
    %47 = arith.cmpf oge, %3, %46 : vector<8x128xf32>
    %cst_17 = arith.constant 1.000000e+00 : f32
    %48 = vector.broadcast %cst_17 : f32 to vector<8x128xf32>
    %49 = arith.select %47, %27, %48 : vector<8x128xi1>, vector<8x128xf32>
    %50 = arith.mulf %49, %40 : vector<8x128xf32>
    %51 = arith.mulf %50, %50 : vector<8x128xf32>
    %52 = arith.mulf %51, %31 : vector<8x128xf32>
    %53 = arith.mulf %45, %45 : vector<8x128xf32>
    %54 = arith.mulf %53, %36 : vector<8x128xf32>
    %55 = arith.cmpi eq, %4, %23 : vector<8x128xi32>
    %56 = arith.cmpi ne, %4, %23 : vector<8x128xi32>
    %c0_i32_18 = arith.constant 0 : i32
    %57 = vector.broadcast %c0_i32_18 : i32 to vector<8x128xi32>
    %58 = arith.cmpi sge, %4, %57 : vector<8x128xi32>
    %59 = arith.andi %56, %58 : vector<8x128xi1>
    %cst_19 = arith.constant -2.500000e-01 : f32
    %60 = vector.broadcast %cst_19 : f32 to vector<8x128xf32>
    %61 = arith.mulf %60, %52 : vector<8x128xf32>
    %cst_20 = arith.constant 0.000000e+00 : f32
    %62 = vector.broadcast %cst_20 : f32 to vector<8x128xf32>
    %63 = arith.select %55, %61, %62 : vector<8x128xi1>, vector<8x128xf32>
    %cst_21 = arith.constant -7.500000e-01 : f32
    %64 = vector.broadcast %cst_21 : f32 to vector<8x128xf32>
    %65 = arith.mulf %64, %54 : vector<8x128xf32>
    %cst_22 = arith.constant 0.000000e+00 : f32
    %66 = vector.broadcast %cst_22 : f32 to vector<8x128xf32>
    %67 = arith.select %59, %65, %66 : vector<8x128xi1>, vector<8x128xf32>
    %68 = arith.addf %63, %67 : vector<8x128xf32>
    %c0_23 = arith.constant 0 : index
    %c0_24 = arith.constant 0 : index
    %69 = vector.load %arg4[%c0_23, %c0_24] : memref<8x128xf32, #tpu.memory_space<vmem>>, vector<8x128xf32>
    %70 = vector.shape_cast %68 : vector<8x128xf32> to vector<1x8x128xf32>
    %cst_25 = arith.constant dense<0.000000e+00> : vector<8x128xf32>
    %71 = vector.multi_reduction <add>, %70, %cst_25 [0] : vector<1x8x128xf32> to vector<8x128xf32>
    %72 = arith.addf %69, %71 : vector<8x128xf32>
    %c0_26 = arith.constant 0 : index
    %c0_27 = arith.constant 0 : index
    %73 = vector.load %arg4[%c0_26, %c0_27] : memref<8x128xf32, #tpu.memory_space<vmem>>, vector<8x128xf32>
    tpu.vector_store %arg4[%c0_26, %c0_27], %72 {strides = array<i32>} : memref<8x128xf32, #tpu.memory_space<vmem>>, vector<8x128xf32>,
    return
  }
  func.func @transform_0(%arg0: i32, %arg1: i32) -> (i32, i32) {
    %c1_i32 = arith.constant 1 : i32
    %0 = arith.muli %arg0, %c1_i32 : i32
    %1 = arith.addi %0, %arg1 : i32
    %c0_i32 = arith.constant 0 : i32
    %c0_i32_0 = arith.constant 0 : i32
    return %1, %c0_i32 : i32, i32
  }
  func.func @transform_1(%arg0: i32, %arg1: i32) -> (i32, i32) {
    %c1_i32 = arith.constant 1 : i32
    %0 = arith.muli %arg0, %c1_i32 : i32
    %1 = arith.addi %0, %arg1 : i32
    %c0_i32 = arith.constant 0 : i32
    %c0_i32_0 = arith.constant 0 : i32
    return %1, %c0_i32 : i32, i32
  }
  func.func @transform_2(%arg0: i32, %arg1: i32) -> (i32, i32) {
    %c0_i32 = arith.constant 0 : i32
    %c0_i32_0 = arith.constant 0 : i32
    return %arg0, %c0_i32 : i32, i32
  }
}

</mosaic_0001>

<bundles_post_ra>
// kernel: tpu_custom_call.1
= control target key start
LH: loop header
LB: loop body
LE: loop exit
PB: predicated region body
PF: predicated region fallthrough
CT: control target
= control target key end

     0   :  { %7 = vsyncpa [#allocation3], 0  ;;  %s879_s0 = inlined_call_operand.hbm [shape: f32[16,128], index: 0, kind: input, shape index: {}]   ;;  %s880_s1 = inlined_call_operand.hbm [shape: s32[16,128], index: 1, kind: input, shape index: {}]   ;;  %s881_s2 = inlined_call_operand.hbm [shape: f32[16,128], index: 2, kind: output, shape index: {}]  }
   0x1   :  { %9 = vsyncpa [#allocation3 + $0x1], 0 }
   0x2   :  { %10 = vsyncpa [#allocation6], 0 }
   0x3   :  { %12 = vsyncpa [#allocation6 + $0x1], 0 }
   0x4   :  { %13 = vsyncpa [#allocation4], 0 }
   0x5   :  { %15 = vsyncpa [#allocation4 + $0x1], 0  ;;  %s654_s9 = smov 0   ;;  %s656_s10 = smov 0  }
   0x6   :  { %s658_s11 = smov 0   ;;  %s660_s12 = smov 0  }
   0x7   :  { %s662_s13 = smov 0   ;;  %s664_s14 = smov 0  }
   0x8 LB: > { %s398_s15 = sadd.s32 4294967295, %s634_s14   ;;  %s399_s16 = sadd.s32 4294967294, %s634_s14   ;;  %s634_s14 = sphi %s664_s14, %s21_s14   ;;  %s630_s13 = sphi %s662_s13, %s901_s13   ;;  %s626_s12 = sphi %s660_s12, %s900_s12   ;;  %s622_s11 = sphi %s658_s11, %s899_s11   ;;  %s618_s10 = sphi %s656_s10, %s898_s10   ;;  %s614_s9 = sphi %s654_s9, %s897_s9  }
   0x9   : > { %s33_s17 = sadd.s32 1, %s630_s13  ;;  %s42_s18 = sadd.s32 1, %s622_s11 }
   0xa   : > { %p35_p0 = scmp.ge.s32.totalorder %s33_s17, 2  ;;  %p49_p1 = scmp.ne.s32.totalorder %s622_s11, %s618_s10 }
   0xb   : > { %p50_p2 = scmp.eq.s32.totalorder %s634_s14, 0  ;;  %p55_p3 = scmp.ne.s32.totalorder %s618_s10, %s614_s9 }
   0xc   : > { %s903_s17 = smov (%p35_p0, %s33_s17), 0  ;;  %p56_p5 = scmp.eq.s32.totalorder %s398_s15, 0 }
   0xd   : > { %p695_p4 = por %p50_p2, %p49_p1  ;;  %s39_s20 = ssub.s32 %s630_s13, %s903_s17 }
   0xe   : > { %p107_p6 = scmp.eq.s32.totalorder %s398_s15, 1  ;;  %p40_p7 = scmp.eq.s32.totalorder %s39_s20, 0 }
   0xf   : > { %p701_p8 = por %p56_p5, %p55_p3  ;;  %p113_p10 = scmp.eq.s32.totalorder %s399_s16, 1 }
  0x10   : > { %p705_p9 = por %p107_p6, %p49_p1  ;;  %p431_p13 = scmp.lt.s32.totalorder %s634_s14, 2 }
  0x11   : > { %s885_s21 = scalar_select %p701_p8, 1, 0 }
  0x12   : > { %s886_s22 = scalar_select %p705_p9, 1, 0 }
  0x13   : > { %s710_s23 = scalar_select %p40_p7, %s622_s11, %s42_s18  }
  0x14   : > { %p712_p11 = por %p113_p10, %p55_p3  ;;  %s719_s25 = sand.u32 1, %s622_s11  }
  0x15   : > { %s402_s26 = sshll.u32 %s719_s25, 3  ;;  %s403_s27 = sshll.u32 %s630_s13, 7 }
  0x16   : > { %s887_s24 = scalar_select %p712_p11, 1, 0 }
  0x17   : > { %s728_s30 = scalar_lea.hbm %s879_s0, %s403_s27  ;;  %s137_s3 = scalar_lea.vmem [#allocation2], %s402_s26 }
  0x18   : > { %s145_s4 = sshll.u32 %s137_s3, 4  ;;  %p736_p0 = pnand %p431_p13, %p695_p4  ;;  %s732_s4 = int_to_ptr.vmem [resolvable:$true] %s145_s4 }
  0x19   : > { %s134_s6 = scalar_lea.sflag [#allocation3], %s719_s25  ;;  %s488_s7 = scalar_lea.hbm %s728_s30, 128 }
  0x1a   : > { %p489_p3 = scmp.ne.s32.totalorder %s728_s30, %s488_s7  ;;  %p490_p5 = pneg %p736_p0 }
  0x1b   : > { %s493_s16 = scalar_lea.hbm %s879_s0, 256  ;;  %p494_p4 = scmp.lt.u32.totalorder %s728_s30, %s879_s0 }
  0x1c   : > { %p491_p6 = pnand %p490_p5, %p489_p3  ;;  %p495_p10 = scmp.lt.u32.totalorder %s493_s16, %s488_s7 }
  0x1d   : > { %p497_p12 = scmp.lt.u32.totalorder %s488_s7, %s728_s30 }
  0x1e   : > { %p492_p7 = pneg %p491_p6  ;;  %p496_p13 = por %p495_p10, %p494_p4 }
  0x20   : > { %p498_p1 = por %p497_p12, %p496_p13 }
  0x22   : > { %p499_p2 = pnand %p498_p1, %p492_p7 }
  0x24   : > { %502 = shalt.err (!%p499_p2)
}
  0x25   : > { %s503_s20 = scalar_lea.vmem %s732_s4, 128  ;;  %s636_s28 = smov [#allocation2]  }
  0x26   : > { %p504_p3 = scmp.ne.s32.totalorder %s732_s4, %s503_s20  ;;  %s508_s29 = sshll.u32 %s636_s28, 4  ;;  %s509_s29 = int_to_ptr.vmem [resolvable:$false] %s508_s29 }
  0x27   : > { %s510_s3 = scalar_lea.vmem %s509_s29, 256  ;;  %p511_p9 = scmp.lt.s32.totalorder %s732_s4, %s509_s29 }
  0x28   : > { %p506_p6 = pnand %p504_p3, %p490_p5  ;;  %p512_p4 = scmp.lt.s32.totalorder %s510_s3, %s503_s20 }
  0x2a   : > { %p507_p11 = pneg %p506_p6  ;;  %p513_p10 = por %p512_p4, %p511_p9 }
  0x2c   : > { %p514_p12 = pnand %p513_p10, %p507_p11 }
  0x2e   : > { %517 = shalt.err (!%p514_p12)
}
  0x2f   : > { %423 = dma.hbm_to_vmem [thread:$0]  (!%p736_p0), %s728_s30, 128, %s732_s4, %s134_s6  }
  0x30   : > { %p889_p1 = scmp.lt.s32.totalorder %s634_s14, 3  ;;  %p890_p2 = scmp.ge.s32.totalorder %s634_s14, 1 }
  0x31   : > { %s781_s16 = scalar_lea.hbm %s880_s1, %s403_s27  ;;  %s156_s18 = scalar_lea.vmem [#allocation5], %s402_s26 }
  0x32   : > { %p772_p7 = pnand %p890_p2, %p889_p1  ;;  %s164_s19 = sshll.u32 %s156_s18, 4  ;;  %s165_s19 = int_to_ptr.vmem [resolvable:$true] %s164_s19 }
  0x33   : > { %s153_s30 = scalar_lea.sflag [#allocation6], %s719_s25  ;;  %s518_s4 = scalar_lea.hbm %s781_s16, 128 }
  0x34   : > { %s891_s7 = scalar_select %p772_p7, 1, 0 }
  0x35   : > { %p519_p9 = scmp.ne.s32.totalorder %s781_s16, %s518_s4  ;;  %s523_s27 = scalar_lea.hbm %s880_s1, 256 }
  0x36   : > { %p524_p3 = scmp.lt.u32.totalorder %s781_s16, %s880_s1  ;;  %p525_p6 = scmp.lt.u32.totalorder %s523_s27, %s518_s4 }
  0x37   : > { %p521_p11 = pnand %p519_p9, %p490_p5  ;;  %p527_p10 = scmp.lt.u32.totalorder %s518_s4, %s781_s16 }
  0x38   : > { %p526_p4 = por %p525_p6, %p524_p3 }
  0x39   : > { %p522_p13 = pneg %p521_p11 }
  0x3a   : > { %p528_p12 = por %p527_p10, %p526_p4 }
  0x3c   : > { %p529_p1 = pnand %p528_p12, %p522_p13 }
  0x3e   : > { %532 = shalt.err (!%p529_p1)
}
  0x3f   : > { %s533_s25 = scalar_lea.vmem %s165_s19, 128  ;;  %s637_s26 = smov [#allocation5]  }
  0x40   : > { %p534_p2 = scmp.ne.s32.totalorder %s165_s19, %s533_s25  ;;  %s538_s3 = sshll.u32 %s637_s26, 4  ;;  %s539_s3 = int_to_ptr.vmem [resolvable:$false] %s538_s3 }
  0x41   : > { %s540_s8 = scalar_lea.vmem %s539_s3, 256  ;;  %p541_p8 = scmp.lt.s32.totalorder %s165_s19, %s539_s3 }
  0x42   : > { %p536_p9 = pnand %p534_p2, %p490_p5  ;;  %p542_p7 = scmp.lt.s32.totalorder %s540_s8, %s533_s25 }
  0x44   : > { %p537_p11 = pneg %p536_p9  ;;  %p543_p3 = por %p542_p7, %p541_p8 }
  0x46   : > { %p544_p6 = pnand %p543_p3, %p537_p11 }
  0x48   : > { %547 = shalt.err (!%p544_p6)
}
  0x49   : > { %426 = dma.hbm_to_vmem [thread:$0]  (!%p736_p0), %s781_s16, 128, %s165_s19, %s153_s30  }
  0x4a   : > { %p892_p13 = scmp.ne.s32.totalorder %s891_s7, 0 }
  0x4b   : > { %s808_s15 = sand.u32 (!%p892_p13), 1, %s618_s10   ;;  %p893_p8 = scmp.ne.s32.totalorder (!%p892_p13), %s885_s21, 0 }
  0x4c   : > { %173 = sbr.rel (%p892_p13) target bundleno = 143 (0x8f), region = 28  ;;  %s811_s18 = sshll.u32 (!%p892_p13), %s808_s15, 3 }
  0x4d   : > { %s176_s4 = scalar_lea.sflag (!%p892_p13), [#allocation3], %s808_s15  ;;  %s179_s6 = scalar_lea.vmem (!%p892_p13), [#allocation2], %s811_s18 }
  0x53   : > { %601 = dma.done.wait (%p893_p8), %s176_s4, 128  }
  0x54   : > { %603 = vsyncadd (%p893_p8), %s176_s4, 4294967168  ;;  %s185_s5 = scalar_lea.sflag [#allocation6], %s808_s15  ;;  %s188_s7 = scalar_lea.vmem [#allocation5], %s811_s18 }
  0x55   : > { %605 = dma.done.wait (%p893_p8), %s185_s5, 128  }
  0x56   : > { %607 = vsyncadd (%p893_p8), %s185_s5, 4294967168  ;;  %v221_v0 = vld [vmem:[%s179_s6] sm:$0xff]  ;;  %v223_v5 = vlaneseq  ;;  %v222_v18 = vld [vmem:[%s188_s7] sm:$0xff]  ;;  %s411_s21 = sshll.u32 %s626_s12, 7  ;;  %s213_s16 = scalar_lea.vmem [#allocation7], %s811_s18 }
  0x57   : > { %v238_v1 = vand.u32 2147483647, %v221_v0  ;;  %v253_v12 = vsub.f32 0.0, %v221_v0  ;;  %vm259_vm0 = vcmp.ge.f32.partialorder %v221_v0, 0.0  ;;  %v251_v19 = vmin.f32 %v221_v0, 0.0  ;;  %s295_s19 = sshll.u32 %s213_s16, 4  ;;  %s830_s27 = scalar_lea.hbm %s881_s2, %s411_s21  ;;  %s832_s19 = int_to_ptr.vmem [resolvable:$true] %s295_s19 }
  0x58   : > { %v224_v7 = vand.u32 127, %v223_v5  ;;  %vm270_vm3 = vcmp.ge.s32.totalorder %v222_v18, 0  ;;  %s282_s28 = scalar_lea.sflag [#allocation4], %s808_s15  ;;  %s548_s29 = scalar_lea.vmem %s832_s19, 128 }
  0x59   : > { %v239_v2 = vsub.f32 0.0, %v238_v1  ;;  %v254_v20 = vmin.f32 %v253_v12, 0.0  ;;  %p549_p0 = scmp.ne.s32.totalorder %s832_s19, %s548_s29  ;;  %p894_p5 = scmp.ne.s32.totalorder %s886_s22, 0 }
  0x5a   : > { %v229_v9 = vand.u32 7, %v224_v7  ;;  %s638_s12 = smov [#allocation7]  }
  0x5b   : > { %v240_v3 = vmul.f32 1.442695, %v239_v2  ;;  %p550_p7 = pnand %p549_p0, %p894_p5  ;;  %s552_s25 = sshll.u32 %s638_s12, 4  ;;  %s553_s25 = int_to_ptr.vmem [resolvable:$false] %s552_s25 }
  0x5c   : > { %v237_v13 = vadd.s32 1, %v229_v9  ;;  %s554_s26 = scalar_lea.vmem %s553_s25, 256  ;;  %p555_p10 = scmp.lt.s32.totalorder %s832_s19, %s553_s25 }
  0x5d   : > { %482 = vpow2.f32 %v240_v3  ;;  %p551_p4 = pneg %p550_p7  ;;  %p556_p12 = scmp.lt.s32.totalorder %s554_s26, %s548_s29 }
  0x5e   : > { %vm269_vm2 = vcmp.ne.s32.totalorder %v222_v18, %v237_v13  ;;  %vm268_vm4 = vcmp.eq.s32.totalorder %v222_v18, %v237_v13 }
  0x5f   : > { %vm271_vm5 = vmand %vm269_vm2, %vm270_vm3  ;;  %p557_p1 = por %p556_p12, %p555_p10 }
  0x61   : > { %p558_p2 = pnand %p557_p1, %p551_p4 }
  0x67   : > { %v483_v4 = vpop.eup %482 }
  0x68   : > { %v242_v6 = vadd.f32 1.0, %v483_v4  ;;  %v245_v8 = vmul.f32 -0.5, %v483_v4  ;;  %v248_v11 = vand.u32 2147483647, %v483_v4  ;;  %v260_v15 = vsel %vm259_vm0, 1.0, %v483_v4 }
  0x69   : > { %v262_v16 = vsel %vm259_vm0, %v483_v4, 1.0 }
  0x6a   : > { %484 = vlog2.f32 %v242_v6  ;;  %v246_v10 = vadd.f32 1.0, %v245_v8  ;;  %vm249_vm1 = vcmp.lt.f32.partialorder %v248_v11, 0.0004427343 }
  0x6b   : > { %486 = vrcp.f32 %v242_v6 }
  0x6c   : > { %v247_v14 = vmul.f32 %v483_v4, %v246_v10 }
  0x74   : > { %v485_v17 = vpop.eup %484 }
  0x75   : > { %v487_v21 = vpop.eup %486  ;;  %v244_v22 = vmul.f32 0.6931472, %v485_v17 }
  0x76   : > { %v261_v23 = vmul.f32 %v487_v21, %v260_v15  ;;  %v263_v24 = vmul.f32 %v487_v21, %v262_v16 }
  0x77   : > { %v250_v25 = vsel %vm249_vm1, %v247_v14, %v244_v22 }
  0x78   : > { %v252_v26 = vsub.f32 %v251_v19, %v250_v25  ;;  %v255_v27 = vsub.f32 %v254_v20, %v250_v25  ;;  %v264_v28 = vmul.f32 %v263_v24, %v263_v24  ;;  %v266_v29 = vmul.f32 %v261_v23, %v261_v23 }
  0x7a   : > { %v265_v30 = vmul.f32 %v264_v28, %v252_v26  ;;  %v267_v31 = vmul.f32 %v266_v29, %v255_v27 }
  0x7c   : > { %v272_v32 = vmul.f32 -0.25, %v265_v30  ;;  %v274_v33 = vmul.f32 -0.75, %v267_v31 }
  0x7e   : > { %v273_v34 = vsel %vm268_vm4, %v272_v32, 0.0  ;;  %v275_v35 = vsel %vm271_vm5, %v274_v33, 0.0 }
  0x7f   : > { %v276_v36 = vadd.f32 %v275_v35, %v273_v34 }
  0x81   : > { %280 = vst [vmem:[%s213_s16] sm:$0xff] %v276_v36 }
  0x82   : > { %561 = shalt.err (!%p558_p2)
}
  0x83   : > { %s562_s3 = scalar_lea.hbm %s830_s27, 128  ;;  %s566_s18 = scalar_lea.hbm %s881_s2, 256 }
  0x84   : > { %p563_p9 = scmp.ne.s32.totalorder %s830_s27, %s562_s3  ;;  %p567_p6 = scmp.lt.u32.totalorder %s830_s27, %s881_s2 }
  0x85   : > { %p568_p13 = scmp.lt.u32.totalorder %s566_s18, %s562_s3  ;;  %p570_p0 = scmp.lt.u32.totalorder %s562_s3, %s830_s27 }
  0x86   : > { %p564_p11 = pnand %p563_p9, %p894_p5 }
  0x87   : > { %p569_p8 = por %p568_p13, %p567_p6 }
  0x88   : > { %p565_p3 = pneg %p564_p11 }
  0x89   : > { %p571_p7 = por %p570_p0, %p569_p8 }
  0x8b   : > { %p572_p4 = pnand %p571_p7, %p565_p3 }
  0x8d   : > { %575 = shalt.err (!%p572_p4)
}
  0x8e   : > { %418 = dma.vmem_to_hbm [thread:$0]  (%p894_p5), %s832_s19, 128, %s830_s27, %s282_s28  }
  0x8f PF: > { %s307_s5 = sand.u32 1, %s614_s9   ;;  %p895_p10 = scmp.ne.s32.totalorder %s887_s24, 0 }
  0x90   : > { %p896_p12 = scmp.ge.s32.totalorder %s634_s14, 2  ;;  %s308_s7 = scalar_lea.sflag [#allocation4], %s307_s5 }
  0x92   : > { %p428_p1 = pnand %p896_p12, %p895_p10 }
  0x94   : > { %609 = dma.done.wait (!%p428_p1), %s308_s7, 128  }
  0x95   : > { %611 = vsyncadd (!%p428_p1), %s308_s7, 4294967168  ;;  %s21_s14 = sadd.s32 1, %s634_s14   ;;  %s897_s9 = smov %s618_s10 }
  0x96   : > { %p18_p2 = scmp.ge.s32.totalorder %s21_s14, 4   ;;  %s898_s10 = smov %s622_s11 }
  0x97   : > { %s899_s11 = smov %s710_s23  ;;  %s900_s12 = smov %s630_s13 }
  0x98   : > { %s901_s13 = smov %s903_s17  ;;  %20 = sbr.rel (!%p18_p2) target bundleno = 8 (0x8), region = 90 }
  0x9f   :  { %313 = vsyncpa [#allocation3], 1 }
  0xa0   :  { %315 = vsyncpa [#allocation3 + $0x1], 1 }
  0xa1   :  { %316 = vsyncpa [#allocation6], 1 }
  0xa2   :  { %318 = vsyncpa [#allocation6 + $0x1], 1 }
  0xa3   :  { %319 = vsyncpa [#allocation4], 1 }
  0xa4   :  { %321 = vsyncpa [#allocation4 + $0x1], 1 }

</bundles_post_ra>
